<compile_context>
chip_gen: v5e
topology: v5e:2x2
jax: 0.10.0
libtpu: 0.0.40
codegen_flags: <defaults>
</compile_context>

<pallas_src>
import jax
import jax.numpy as jnp
from jax.experimental import pallas as pl
from jax.experimental.pallas import tpu as pltpu

HIDDEN = 128   # nn.Linear(input_dim, 128)
LANE = 128     # TPU lane width


def _round_up(n, m):
    return ((n + m - 1) // m) * m


# ---------------------------------------------------------------------------
# Kernel
# ---------------------------------------------------------------------------
def resnet_fnn_kernel(x_ref, w1_ref, wres_ref, wo_ref, bhid_ref, bo_ref, out_ref):
    # x_ref: (tile_b, in_pad) bf16     w1_ref: (in_pad, 128) bf16
    # wres_ref: (4, 128, 128) bf16     wo_ref: (128, out_pad) bf16
    # bhid_ref: (5, 128) f32 [b1, r1b1, r1b2, r2b1, r2b2]
    # bo_ref:   (1, out_pad) f32       out_ref: (tile_b, out_pad) f32/bf16
    f32 = jnp.float32
    bf16 = jnp.bfloat16

    # h = relu(fc1(x)) -- bf16 MXU operands, f32 accumulation.
    h = jnp.dot(x_ref[...], w1_ref[...], preferred_element_type=f32)
    h = jnp.maximum(h + bhid_ref[0:1, :], 0.0)

    def res_block(h, w_idx, b_idx):
        # relu( Linear(ReLU(Linear(h))) + h ); elementwise stays f32.
        t = jnp.dot(h.astype(bf16), wres_ref[w_idx], preferred_element_type=f32)
        t = jnp.maximum(t + bhid_ref[b_idx:b_idx + 1, :], 0.0)
        t = jnp.dot(t.astype(bf16), wres_ref[w_idx + 1], preferred_element_type=f32)
        t = t + bhid_ref[b_idx + 1:b_idx + 2, :]
        return jnp.maximum(t + h, 0.0)

    h = res_block(h, 0, 1)   # res1
    h = res_block(h, 2, 3)   # res2

    # Dropout(p=0.3): identity at inference time (PyTorch eval mode).
    # TODO(synk): training-mode dropout would need pltpu.prng_random_bits masking.

    out = jnp.dot(h.astype(bf16), wo_ref[...], preferred_element_type=f32)
    out_ref[...] = (out + bo_ref[...]).astype(out_ref.dtype)


# ---------------------------------------------------------------------------
# Parameter packing
# ---------------------------------------------------------------------------
def pack_params(p, input_dim, num_classes):
    """Cast weights to bf16 and stack operands; pad feature dim only when large."""
    # Feature padding policy: keep input_dim unpadded when < 128 (legal
    # full-array block dim; avoids up to 8x inflated x reads); lane-pad when
    # input_dim >= 128 so the dominant x DMA stays lane-dense.
    in_pad = input_dim if input_dim < LANE else _round_up(input_dim, LANE)
    # Output is never lane-padded: fewer HBM bytes on the dominant write stream.
    out_pad = num_classes

    w1 = p["w1"]
    if in_pad != input_dim:
        w1 = jnp.zeros((in_pad, HIDDEN), jnp.float32).at[:input_dim, :].set(w1)
    wo = p["wo"]
    wres = jnp.stack([p["r1w1"], p["r1w2"], p["r2w1"], p["r2w2"]], axis=0)
    bhid = jnp.stack([p["b1"], p["r1b1"], p["r1b2"], p["r2b1"], p["r2b2"]], axis=0)
    bo = p["bo"][None, :]

    return dict(
        w1=w1.astype(jnp.bfloat16),
        wres=wres.astype(jnp.bfloat16),
        wo=wo.astype(jnp.bfloat16),
        bhid=bhid.astype(jnp.float32),
        bo=bo.astype(jnp.float32),
        in_pad=in_pad,
        out_pad=out_pad,
        num_classes=num_classes,
        input_dim=input_dim,
    )


# ---------------------------------------------------------------------------
# Tiling / VMEM helpers
# ---------------------------------------------------------------------------
def _choose_batch_tile(B, *, batch_tile=1024, min_tile=256, min_grid=4):
    """Batch tile: >= min_grid grid steps when B allows (2 TCs x 2-deep
    pipeline), >= min_tile rows to amortize per-step overhead, multiple of 16
    (bf16 row packing), minimal batch-padding waste."""
    B16 = _round_up(max(B, 16), 16)
    if B16 <= min_tile:
        return B16                                   # single small tile
    n = max(pl.cdiv(B16, batch_tile), min(min_grid, B16 // min_tile))
    tile = _round_up(pl.cdiv(B16, n), 16)
    return max(min_tile, min(tile, batch_tile))


def _vmem_footprint(tile_b, in_pad, out_pad, out_bytes):
    """Rough VMEM bytes: double-buffered x/out/weights + f32 intermediates."""
    x_buf = 2 * tile_b * in_pad * 2
    out_buf = 2 * tile_b * out_pad * out_bytes
    w_buf = 2 * (in_pad * HIDDEN * 2 + 4 * HIDDEN * HIDDEN * 2
                 + HIDDEN * out_pad * 2 + 5 * HIDDEN * 4 + out_pad * 4)
    interm = 4 * tile_b * HIDDEN * 4
    return x_buf + out_buf + w_buf + interm


# ---------------------------------------------------------------------------
# Wrapper
# ---------------------------------------------------------------------------
def resnet_fnn_forward(x, packed, *, batch_tile=1024, output_dtype=jnp.float32):
    """x: (B, input_dim) float32.  packed: output of pack_params."""
    B, input_dim = x.shape
    assert input_dim == packed["input_dim"]
    in_pad, out_pad = packed["in_pad"], packed["out_pad"]
    num_classes = packed["num_classes"]
    out_bytes = jnp.dtype(output_dtype).itemsize

    tile_b = _choose_batch_tile(B, batch_tile=batch_tile)

    # VMEM guard (v7x has only 64 MiB physical): shrink the tile before the
    # compiler is forced to spill, then raise the scoped limit explicitly
    # (v5e default is only 16 MiB, v6e/v7x 32 MiB).
    # TODO(synk): for very large input_dim, add a K grid axis over in_pad with
    # an f32 accumulator scratch instead of shrinking tile_b.
    VMEM_BUDGET = 40 * 1024 * 1024
    while tile_b > 256 and _vmem_footprint(tile_b, in_pad, out_pad, out_bytes) > VMEM_BUDGET:
        tile_b = max(256, _round_up(tile_b // 2, 16))
    footprint = _vmem_footprint(tile_b, in_pad, out_pad, out_bytes)
    vmem_limit = int(min(100 * 1024 * 1024,
                         max(32 * 1024 * 1024, footprint + (16 << 20))))

    B_pad = _round_up(B, tile_b)

    # Build the padded input directly in bf16 (no f32 temp; halves x DMA).
    x_bf = x.astype(jnp.bfloat16)
    if B_pad != B or in_pad != input_dim:
        x_in = jnp.zeros((B_pad, in_pad), jnp.bfloat16).at[:B, :input_dim].set(x_bf)
    else:
        x_in = x_bf

    grid_spec = pltpu.PrefetchScalarGridSpec(
        num_scalar_prefetch=0,
        grid=(B_pad // tile_b,),
        in_specs=[
            pl.BlockSpec((tile_b, in_pad), lambda i: (i, 0)),          # x
            pl.BlockSpec((in_pad, HIDDEN), lambda i: (0, 0)),          # w1
            pl.BlockSpec((4, HIDDEN, HIDDEN), lambda i: (0, 0, 0)),    # res weights
            pl.BlockSpec((HIDDEN, out_pad), lambda i: (0, 0)),         # wo
            pl.BlockSpec((5, HIDDEN), lambda i: (0, 0)),               # hidden biases
            pl.BlockSpec((1, out_pad), lambda i: (0, 0)),              # bo
        ],
        out_specs=pl.BlockSpec((tile_b, out_pad), lambda i: (i, 0)),
    )

    out = pl.pallas_call(
        resnet_fnn_kernel,
        out_shape=jax.ShapeDtypeStruct((B_pad, out_pad), output_dtype),
        grid_spec=grid_spec,
        compiler_params=pltpu.CompilerParams(
            dimension_semantics=("parallel",),   # shards batch tiles across TCs (v7x)
            vmem_limit_bytes=vmem_limit,
        ),
    )(x_in, packed["w1"], packed["wres"], packed["wo"],
      packed["bhid"], packed["bo"])

    if B_pad != B:
        out = out[:B]
    return out   # (B, num_classes); no column slice needed (output unpadded)


# ---------------------------------------------------------------------------
# Params + reference
# ---------------------------------------------------------------------------
def init_params(key, input_dim, num_classes):
    """Deterministic synthetic init (PyTorch-Linear-style uniform bounds)."""
    def linear(key, fan_in, fan_out):
        kw, kb = jax.random.split(key)
        bound = 1.0 / jnp.sqrt(fan_in)
        w = jax.random.uniform(kw, (fan_in, fan_out), jnp.float32, -bound, bound)
        b = jax.random.uniform(kb, (fan_out,), jnp.float32, -bound, bound)
        return w, b

    keys = jax.random.split(key, 6)
    p = {}
    p["w1"], p["b1"] = linear(keys[0], input_dim, HIDDEN)
    p["r1w1"], p["r1b1"] = linear(keys[1], HIDDEN, HIDDEN)
    p["r1w2"], p["r1b2"] = linear(keys[2], HIDDEN, HIDDEN)
    p["r2w1"], p["r2b1"] = linear(keys[3], HIDDEN, HIDDEN)
    p["r2w2"], p["r2b2"] = linear(keys[4], HIDDEN, HIDDEN)
    p["wo"], p["bo"] = linear(keys[5], HIDDEN, num_classes)
    return p


def reference_forward(x, p):
    """Pure-JAX reference matching the PyTorch forward (eval mode) with the
    same bf16-operand / f32-accumulate matmul quantization as the kernel."""
    bf16 = jnp.bfloat16

    def dot(a, w):
        return jnp.dot(a.astype(bf16), w.astype(bf16),
                       preferred_element_type=jnp.float32)

    h = jnp.maximum(dot(x, p["w1"]) + p["b1"], 0.0)
    t = jnp.maximum(dot(h, p["r1w1"]) + p["r1b1"], 0.0)
    t = dot(t, p["r1w2"]) + p["r1b2"]
    h = jnp.maximum(t + h, 0.0)
    t = jnp.maximum(dot(h, p["r2w1"]) + p["r2b1"], 0.0)
    t = dot(t, p["r2w2"]) + p["r2b2"]
    h = jnp.maximum(t + h, 0.0)
    return dot(h, p["wo"]) + p["bo"]


if __name__ == "__main__":
    key = jax.random.PRNGKey(0)
    k_x, k_p, k_x2 = jax.random.split(key, 3)

    input_dim, num_classes = 16, 4
    params = init_params(k_p, input_dim, num_classes)
    packed = pack_params(params, input_dim, num_classes)

    # Small batch (single-tile path).
    B = 8
    x = jax.random.normal(k_x, (B, input_dim), jnp.float32)
    out = jax.block_until_ready(resnet_fnn_forward(x, packed))
    ref = reference_forward(x, params)
    assert out.shape == (B, num_classes)
    assert jnp.allclose(out, ref, atol=1e-2, rtol=1e-2), "mismatch (small batch)"

    # Larger batch: multi-step grid (DMA/compute overlap path) + batch padding.
    B2 = 600
    x2 = jax.random.normal(k_x2, (B2, input_dim), jnp.float32)
    out2 = jax.block_until_ready(resnet_fnn_forward(x2, packed))
    ref2 = reference_forward(x2, params)
    assert out2.shape == (B2, num_classes)
    assert jnp.allclose(out2, ref2, atol=1e-2, rtol=1e-2), "mismatch (large batch)"

    # Optional lean (bf16) output stream, precision-gated behind a flag.
    out_bf = jax.block_until_ready(
        resnet_fnn_forward(x2, packed, output_dtype=jnp.bfloat16))
    assert out_bf.dtype == jnp.bfloat16
    assert jnp.allclose(out_bf.astype(jnp.float32), ref2, atol=5e-2, rtol=5e-2), \
        "mismatch (bf16 output)"

    print("KERNEL_OK")
</pallas_src>

<mosaic_0001>
module attributes {stable_mosaic.version = 11 : i64} {
  func.func @resnet_fnn_kernel(%arg0: i32, %arg1: memref<16x16xbf16, #tpu.memory_space<vmem>>, %arg2: memref<16x128xbf16, #tpu.memory_space<vmem>>, %arg3: memref<4x128x128xbf16, #tpu.memory_space<vmem>>, %arg4: memref<128x4xbf16, #tpu.memory_space<vmem>>, %arg5: memref<5x128xf32, #tpu.memory_space<vmem>>, %arg6: memref<1x4xf32, #tpu.memory_space<vmem>>, %arg7: memref<16x4xf32, #tpu.memory_space<vmem>>) attributes {dimension_semantics = [#tpu.dimension_semantics<parallel>], iteration_bounds = array<i64: 1>, scalar_prefetch = 0 : i64, scratch_operands = 0 : i64, tpu.core_type = #tpu.core_type<tc>, window_params = [{transform_indices = @transform_0, window_bounds = array<i64: 16, 16>}, {pipeline_mode = #tpu.pipeline_mode<synchronous>, transform_indices = @transform_1, window_bounds = array<i64: 16, 128>}, {pipeline_mode = #tpu.pipeline_mode<synchronous>, transform_indices = @transform_2, window_bounds = array<i64: 4, 128, 128>}, {pipeline_mode = #tpu.pipeline_mode<synchronous>, transform_indices = @transform_3, window_bounds = array<i64: 128, 4>}, {pipeline_mode = #tpu.pipeline_mode<synchronous>, transform_indices = @transform_4, window_bounds = array<i64: 5, 128>}, {pipeline_mode = #tpu.pipeline_mode<synchronous>, transform_indices = @transform_5, window_bounds = array<i64: 1, 4>}, {transform_indices = @transform_6, window_bounds = array<i64: 16, 4>}]} {
    %c0 = arith.constant 0 : index
    %c0_0 = arith.constant 0 : index
    %0 = vector.load %arg1[%c0, %c0_0] : memref<16x16xbf16, #tpu.memory_space<vmem>>, vector<16x16xbf16>
    %c0_1 = arith.constant 0 : index
    %c0_2 = arith.constant 0 : index
    %1 = vector.load %arg2[%c0_1, %c0_2] : memref<16x128xbf16, #tpu.memory_space<vmem>>, vector<16x128xbf16>
    %cst = arith.constant dense<0.000000e+00> : vector<16x128xf32>
    %2 = tpu.matmul %0, %1, %cst {dimension_numbers = #tpu.dot_dimension_numbers<[1], [0], [0], [1], [0, 0, 1, 1], [], []>} : vector<16x16xbf16>, vector<16x128xbf16>, vector<16x128xf32> -> vector<16x128xf32>
    %c0_3 = arith.constant 0 : index
    %c0_4 = arith.constant 0 : index
    %3 = vector.load %arg5[%c0_3, %c0_4] : memref<5x128xf32, #tpu.memory_space<vmem>>, vector<1x128xf32>
    %4 = vector.broadcast %3 : vector<1x128xf32> to vector<16x128xf32>
    %5 = arith.addf %2, %4 : vector<16x128xf32>
    %cst_5 = arith.constant 0.000000e+00 : f32
    %6 = vector.broadcast %cst_5 : f32 to vector<16x128xf32>
    %7 = arith.maximumf %5, %6 : vector<16x128xf32>
    %8 = arith.truncf %7 : vector<16x128xf32> to vector<16x128xbf16>
    %c0_6 = arith.constant 0 : index
    %c0_7 = arith.constant 0 : index
    %c0_8 = arith.constant 0 : index
    %9 = vector.load %arg3[%c0_6, %c0_7, %c0_8] : memref<4x128x128xbf16, #tpu.memory_space<vmem>>, vector<1x128x128xbf16>
    %10 = vector.shape_cast %9 : vector<1x128x128xbf16> to vector<128x128xbf16>
    %cst_9 = arith.constant dense<0.000000e+00> : vector<16x128xf32>
    %11 = tpu.matmul %8, %10, %cst_9 {dimension_numbers = #tpu.dot_dimension_numbers<[1], [0], [0], [1], [0, 0, 1, 1], [], []>} : vector<16x128xbf16>, vector<128x128xbf16>, vector<16x128xf32> -> vector<16x128xf32>
    %c1 = arith.constant 1 : index
    %c0_10 = arith.constant 0 : index
    %12 = vector.load %arg5[%c1, %c0_10] : memref<5x128xf32, #tpu.memory_space<vmem>>, vector<1x128xf32>
    %13 = vector.broadcast %12 : vector<1x128xf32> to vector<16x128xf32>
    %14 = arith.addf %11, %13 : vector<16x128xf32>
    %cst_11 = arith.constant 0.000000e+00 : f32
    %15 = vector.broadcast %cst_11 : f32 to vector<16x128xf32>
    %16 = arith.maximumf %14, %15 : vector<16x128xf32>
    %17 = arith.truncf %16 : vector<16x128xf32> to vector<16x128xbf16>
    %c1_12 = arith.constant 1 : index
    %c0_13 = arith.constant 0 : index
    %c0_14 = arith.constant 0 : index
    %18 = vector.load %arg3[%c1_12, %c0_13, %c0_14] : memref<4x128x128xbf16, #tpu.memory_space<vmem>>, vector<1x128x128xbf16>
    %19 = vector.shape_cast %18 : vector<1x128x128xbf16> to vector<128x128xbf16>
    %cst_15 = arith.constant dense<0.000000e+00> : vector<16x128xf32>
    %20 = tpu.matmul %17, %19, %cst_15 {dimension_numbers = #tpu.dot_dimension_numbers<[1], [0], [0], [1], [0, 0, 1, 1], [], []>} : vector<16x128xbf16>, vector<128x128xbf16>, vector<16x128xf32> -> vector<16x128xf32>
    %c2 = arith.constant 2 : index
    %c0_16 = arith.constant 0 : index
    %21 = vector.load %arg5[%c2, %c0_16] : memref<5x128xf32, #tpu.memory_space<vmem>>, vector<1x128xf32>
    %22 = vector.broadcast %21 : vector<1x128xf32> to vector<16x128xf32>
    %23 = arith.addf %20, %22 : vector<16x128xf32>
    %24 = arith.addf %23, %7 : vector<16x128xf32>
    %cst_17 = arith.constant 0.000000e+00 : f32
    %25 = vector.broadcast %cst_17 : f32 to vector<16x128xf32>
    %26 = arith.maximumf %24, %25 : vector<16x128xf32>
    %27 = arith.truncf %26 : vector<16x128xf32> to vector<16x128xbf16>
    %c2_18 = arith.constant 2 : index
    %c0_19 = arith.constant 0 : index
    %c0_20 = arith.constant 0 : index
    %28 = vector.load %arg3[%c2_18, %c0_19, %c0_20] : memref<4x128x128xbf16, #tpu.memory_space<vmem>>, vector<1x128x128xbf16>
    %29 = vector.shape_cast %28 : vector<1x128x128xbf16> to vector<128x128xbf16>
    %cst_21 = arith.constant dense<0.000000e+00> : vector<16x128xf32>
    %30 = tpu.matmul %27, %29, %cst_21 {dimension_numbers = #tpu.dot_dimension_numbers<[1], [0], [0], [1], [0, 0, 1, 1], [], []>} : vector<16x128xbf16>, vector<128x128xbf16>, vector<16x128xf32> -> vector<16x128xf32>
    %c3 = arith.constant 3 : index
    %c0_22 = arith.constant 0 : index
    %31 = vector.load %arg5[%c3, %c0_22] : memref<5x128xf32, #tpu.memory_space<vmem>>, vector<1x128xf32>
    %32 = vector.broadcast %31 : vector<1x128xf32> to vector<16x128xf32>
    %33 = arith.addf %30, %32 : vector<16x128xf32>
    %cst_23 = arith.constant 0.000000e+00 : f32
    %34 = vector.broadcast %cst_23 : f32 to vector<16x128xf32>
    %35 = arith.maximumf %33, %34 : vector<16x128xf32>
    %36 = arith.truncf %35 : vector<16x128xf32> to vector<16x128xbf16>
    %c3_24 = arith.constant 3 : index
    %c0_25 = arith.constant 0 : index
    %c0_26 = arith.constant 0 : index
    %37 = vector.load %arg3[%c3_24, %c0_25, %c0_26] : memref<4x128x128xbf16, #tpu.memory_space<vmem>>, vector<1x128x128xbf16>
    %38 = vector.shape_cast %37 : vector<1x128x128xbf16> to vector<128x128xbf16>
    %cst_27 = arith.constant dense<0.000000e+00> : vector<16x128xf32>
    %39 = tpu.matmul %36, %38, %cst_27 {dimension_numbers = #tpu.dot_dimension_numbers<[1], [0], [0], [1], [0, 0, 1, 1], [], []>} : vector<16x128xbf16>, vector<128x128xbf16>, vector<16x128xf32> -> vector<16x128xf32>
    %c4 = arith.constant 4 : index
    %c0_28 = arith.constant 0 : index
    %40 = vector.load %arg5[%c4, %c0_28] : memref<5x128xf32, #tpu.memory_space<vmem>>, vector<1x128xf32>
    %41 = vector.broadcast %40 : vector<1x128xf32> to vector<16x128xf32>
    %42 = arith.addf %39, %41 : vector<16x128xf32>
    %43 = arith.addf %42, %26 : vector<16x128xf32>
    %cst_29 = arith.constant 0.000000e+00 : f32
    %44 = vector.broadcast %cst_29 : f32 to vector<16x128xf32>
    %45 = arith.maximumf %43, %44 : vector<16x128xf32>
    %46 = arith.truncf %45 : vector<16x128xf32> to vector<16x128xbf16>
    %c0_30 = arith.constant 0 : index
    %c0_31 = arith.constant 0 : index
    %47 = vector.load %arg4[%c0_30, %c0_31] : memref<128x4xbf16, #tpu.memory_space<vmem>>, vector<128x4xbf16>
    %cst_32 = arith.constant dense<0.000000e+00> : vector<16x4xf32>
    %48 = tpu.matmul %46, %47, %cst_32 {dimension_numbers = #tpu.dot_dimension_numbers<[1], [0], [0], [1], [0, 0, 1, 1], [], []>} : vector<16x128xbf16>, vector<128x4xbf16>, vector<16x4xf32> -> vector<16x4xf32>
    %c0_33 = arith.constant 0 : index
    %c0_34 = arith.constant 0 : index
    %49 = vector.load %arg6[%c0_33, %c0_34] : memref<1x4xf32, #tpu.memory_space<vmem>>, vector<1x4xf32>
    %50 = vector.broadcast %49 : vector<1x4xf32> to vector<16x4xf32>
    %51 = arith.addf %48, %50 : vector<16x4xf32>
    %c0_35 = arith.constant 0 : index
    %c0_36 = arith.constant 0 : index
    %52 = vector.load %arg7[%c0_35, %c0_36] : memref<16x4xf32, #tpu.memory_space<vmem>>, vector<16x4xf32>
    tpu.vector_store %arg7[%c0_35, %c0_36], %51 {strides = array<i32>} : memref<16x4xf32, #tpu.memory_space<vmem>>, vector<16x4xf32>,
    return
  }
  func.func @transform_0(%arg0: i32) -> (i32, i32) {
    %c0_i32 = arith.constant 0 : i32
    %c0_i32_0 = arith.constant 0 : i32
    return %arg0, %c0_i32 : i32, i32
  }
  func.func @transform_1(%arg0: i32) -> (i32, i32) {
    %c0_i32 = arith.constant 0 : i32
    %c0_i32_0 = arith.constant 0 : i32
    %c0_i32_1 = arith.constant 0 : i32
    return %c0_i32, %c0_i32_0 : i32, i32
  }
  func.func @transform_2(%arg0: i32) -> (i32, i32, i32) {
    %c0_i32 = arith.constant 0 : i32
    %c0_i32_0 = arith.constant 0 : i32
    %c0_i32_1 = arith.constant 0 : i32
    %c0_i32_2 = arith.constant 0 : i32
    return %c0_i32, %c0_i32_0, %c0_i32_1 : i32, i32, i32
  }
  func.func @transform_3(%arg0: i32) -> (i32, i32) {
    %c0_i32 = arith.constant 0 : i32
    %c0_i32_0 = arith.constant 0 : i32
    %c0_i32_1 = arith.constant 0 : i32
    return %c0_i32, %c0_i32_0 : i32, i32
  }
  func.func @transform_4(%arg0: i32) -> (i32, i32) {
    %c0_i32 = arith.constant 0 : i32
    %c0_i32_0 = arith.constant 0 : i32
    %c0_i32_1 = arith.constant 0 : i32
    return %c0_i32, %c0_i32_0 : i32, i32
  }
  func.func @transform_5(%arg0: i32) -> (i32, i32) {
    %c0_i32 = arith.constant 0 : i32
    %c0_i32_0 = arith.constant 0 : i32
    %c0_i32_1 = arith.constant 0 : i32
    return %c0_i32, %c0_i32_0 : i32, i32
  }
  func.func @transform_6(%arg0: i32) -> (i32, i32) {
    %c0_i32 = arith.constant 0 : i32
    %c0_i32_0 = arith.constant 0 : i32
    return %arg0, %c0_i32 : i32, i32
  }
}

</mosaic_0001>

<bundles_post_ra>
// kernel: tpu_custom_call.1
= control target key start
LH: loop header
LB: loop body
LE: loop exit
PB: predicated region body
PF: predicated region fallthrough
CT: control target
= control target key end

     0   :  { %11 = vsyncpa [#allocation3], 0  ;;  %s753_s24 = smov [#allocation2]   ;;  %s754_s26 = smov 64   ;;  %s848_s0 = inlined_call_operand.vmem [shape: bf16[16,16], index: 0, kind: input, shape index: {}]   ;;  %s849_s1 = inlined_call_operand.vmem [shape: bf16[16,128], index: 1, kind: input, shape index: {}]   ;;  %s850_s2 = inlined_call_operand.hbm [shape: bf16[4,128,128], index: 2, kind: input, shape index: {}]   ;;  %s851_s3 = inlined_call_operand.vmem [shape: bf16[128,4], index: 3, kind: input, shape index: {}]   ;;  %s852_s4 = inlined_call_operand.vmem [shape: f32[5,128], index: 4, kind: input, shape index: {}]   ;;  %s853_s5 = inlined_call_operand.vmem [shape: f32[1,4], index: 5, kind: input, shape index: {}]   ;;  %s854_s6 = inlined_call_operand.vmem [shape: f32[16,4], index: 6, kind: output, shape index: {}]  }
   0x1   :  { %s20_s23 = sshll.u32 %s850_s2, 4  ;;  %s22_s25 = sshll.u32 %s753_s24, 4  ;;  %s21_s23 = int_to_ptr.hbm [resolvable:$true] %s20_s23  ;;  %s23_s25 = int_to_ptr.vmem [resolvable:$true] %s22_s25 }
   0x2   :  { %s755_s27 = smov 4  }
   0x3   :  { %28 = dma.hbm_to_vmem [thread:$0]  %s21_s23, 4096, %s23_s25, [#allocation3], %s754_s26, %s754_s26, %s755_s27  }
   0x4   :  { %751 = dma.done.wait [#allocation3], 4096  }
   0x5   :  { %752 = vsyncadd [#allocation3], 4294963200  ;;  %v677_v0 = vld [vmem:[%s849_s1] sm:$0xff]  ;;  %v685_v1 = vld [vmem:[#allocation2 + $0x38] sm:$0xff]  ;;  %vm57_vm0 = vcmask 130048   ;;  %vm499_vm1 = vcmask 31744  }
   0x6   :  { %v676_v2 = vld [vmem:[%s848_s0] sm:$0xff]  ;;  %68 = vmatpush.bf16.msra.mxu0 %v677_v0  ;;  %144 = vmatpush.bf16.msra.mxu1 %v685_v1  ;;  %v684_v3 = vld [vmem:[#allocation2 + $0x30] sm:$0xff]  ;;  %v683_v4 = vld [vmem:[#allocation2 + $0x28] sm:$0xff] }
   0x7   :  { %v682_v5 = vld [vmem:[#allocation2 + $0x20] sm:$0xff]  ;;  %v681_v6 = vld [vmem:[#allocation2 + $0x18] sm:$0xff]  ;;  %v680_v7 = vld [vmem:[#allocation2 + $0x10] sm:$0xff] }
   0x8   :  { %v679_v8 = vld [vmem:[#allocation2 + $0x8] sm:$0xff]  ;;  %v678_v9 = vld [vmem:[#allocation2] sm:$0xff]  ;;  %v693_v10 = vld [vmem:[#allocation2 + $0x78] sm:$0xff] }
   0x9   :  { %515 = vmatmul.msk.bf16.vlgmr.msra.gmra.mxu0 %vm57_vm0, %v676_v2  ;;  %228 = vmatpush.bf16.msra.mxu2 %v693_v10  ;;  %v692_v11 = vld [vmem:[#allocation2 + $0x70] sm:$0xff]  ;;  %v691_v12 = vld [vmem:[#allocation2 + $0x68] sm:$0xff]  ;;  %v690_v13 = vld [vmem:[#allocation2 + $0x60] sm:$0xff] }
   0xa   :  { %145 = vmatpush.bf16.msra.mxu1 %v684_v3  ;;  %v721_v15 = vld [vmem:[%s852_s4] ss:$0 sm:$0xff]  ;;  %v689_v22 = vld [vmem:[#allocation2 + $0x58] sm:$0xff]  ;;  %v688_v23 = vld [vmem:[#allocation2 + $0x50] sm:$0xff] }
   0xb   :  { %v687_v24 = vld [vmem:[#allocation2 + $0x48] sm:$0xff]  ;;  %v686_v25 = vld [vmem:[#allocation2 + $0x40] sm:$0xff]  ;;  %v701_v26 = vld [vmem:[#allocation2 + $0xb8] sm:$0xff] }
   0xc   :  { %314 = vmatpush.bf16.msra.mxu3 %v701_v26  ;;  %v700_v27 = vld [vmem:[#allocation2 + $0xb0] sm:$0xff]  ;;  %v699_v28 = vld [vmem:[#allocation2 + $0xa8] sm:$0xff]  ;;  %v698_v29 = vld [vmem:[#allocation2 + $0xa0] sm:$0xff] }
   0xd   :  { %229 = vmatpush.bf16.msra.mxu2 %v692_v11  ;;  %v722_v31 = vld [vmem:[%s852_s4 + $0x1] ss:$0 sm:$0xff]  ;;  %v697_v38 = vld [vmem:[#allocation2 + $0x98] sm:$0xff]  ;;  %v696_v39 = vld [vmem:[#allocation2 + $0x90] sm:$0xff] }
   0xe   :  { %146 = vmatpush.bf16.msra.mxu1 %v683_v4  ;;  %v695_v40 = vld [vmem:[#allocation2 + $0x88] sm:$0xff]  ;;  %v694_v41 = vld [vmem:[#allocation2 + $0x80] sm:$0xff]  ;;  %v709_v42 = vld [vmem:[#allocation2 + $0xf8] sm:$0xff] }
   0xf   :  { %398 = vmatpush.bf16.msrb.mxu0 %v709_v42  ;;  %v708_v43 = vld [vmem:[#allocation2 + $0xf0] sm:$0xff]  ;;  %v707_v44 = vld [vmem:[#allocation2 + $0xe8] sm:$0xff]  ;;  %v706_v45 = vld [vmem:[#allocation2 + $0xe0] sm:$0xff] }
  0x10   :  { %315 = vmatpush.bf16.msra.mxu3 %v700_v27  ;;  %v723_v47 = vld [vmem:[%s852_s4 + $0x2] ss:$0 sm:$0xff]  ;;  %v705_v56 = vld [vmem:[#allocation2 + $0xd8] sm:$0xff]  ;;  %v704_v57 = vld [vmem:[#allocation2 + $0xd0] sm:$0xff] }
  0x11   :  { %230 = vmatpush.bf16.msra.mxu2 %v691_v12  ;;  %v703_v58 = vld [vmem:[#allocation2 + $0xc8] sm:$0xff]  ;;  %v702_v59 = vld [vmem:[#allocation2 + $0xc0] sm:$0xff]  ;;  %v717_v60 = vld [vmem:[%s851_s3 + $0x38] sm:$0xff] }
  0x12   :  { %147 = vmatpush.bf16.msra.mxu1 %v682_v5  ;;  %v716_v61 = vld [vmem:[%s851_s3 + $0x30] sm:$0xff]  ;;  %v715_v62 = vld [vmem:[%s851_s3 + $0x28] sm:$0xff]  ;;  %v714_v63 = vld [vmem:[%s851_s3 + $0x20] sm:$0xff] }
  0x13   :  { %399 = vmatpush.bf16.msrb.mxu0 %v708_v43  ;;  %v724_v1 = vld [vmem:[%s852_s4 + $0x3] ss:$0 sm:$0xff]  ;;  %v711_v10 = vld [vmem:[%s851_s3 + $0x8] sm:$0xff] }
  0x14   :  { %316 = vmatpush.bf16.msra.mxu3 %v699_v28  ;;  %v710_v11 = vld [vmem:[%s851_s3] sm:$0xff] }
  0x15   :  { %231 = vmatpush.bf16.msra.mxu2 %v690_v13  ;;  %v725_v13 = vld [vmem:[%s852_s4 + $0x4] ss:$0 sm:$0xff] }
  0x16   :  { %148 = vmatpush.bf16.msra.mxu1 %v681_v6 }
  0x17   :  { %400 = vmatpush.bf16.msrb.mxu0 %v707_v44 }
  0x18   :  { %317 = vmatpush.bf16.msra.mxu3 %v698_v29 }
  0x19   :  { %232 = vmatpush.bf16.msra.mxu2 %v689_v22  ;;  %v726_v22 = vld [vmem:[%s853_s5] ss:$0 sm:$0xff] }
  0x1a   :  { %149 = vmatpush.bf16.msra.mxu1 %v680_v7 }
  0x1b   :  { %401 = vmatpush.bf16.msrb.mxu0 %v706_v45 }
  0x1c   :  { %318 = vmatpush.bf16.msra.mxu3 %v697_v38 }
  0x1d   :  { %233 = vmatpush.bf16.msra.mxu2 %v688_v23 }
  0x1e   :  { %150 = vmatpush.bf16.msra.mxu1 %v679_v8  ;;  %v713_v8 = vld [vmem:[%s851_s3 + $0x18] sm:$0xff] }
  0x1f   :  { %402 = vmatpush.bf16.msrb.mxu0 %v705_v56 }
  0x20   :  { %319 = vmatpush.bf16.msra.mxu3 %v696_v39 }
  0x21   :  { %234 = vmatpush.bf16.msra.mxu2 %v687_v24 }
  0x22   :  { %151 = vmatpush.bf16.msra.mxu1 %v678_v9  ;;  %v712_v9 = vld [vmem:[%s851_s3 + $0x10] sm:$0xff] }
  0x23   :  { %403 = vmatpush.bf16.msrb.mxu0 %v704_v57 }
  0x24   :  { %320 = vmatpush.bf16.msra.mxu3 %v695_v40 }
  0x25   :  { %235 = vmatpush.bf16.msra.mxu2 %v686_v25 }
  0x26   :  { %485 = vmatpush.bf16.msrb.mxu1 %v717_v60 }
  0x27   :  { %404 = vmatpush.bf16.msrb.mxu0 %v703_v58 }
  0x28   :  { %321 = vmatpush.bf16.msra.mxu3 %v694_v41 }
  0x2a   :  { %486 = vmatpush.bf16.msrb.mxu1 %v716_v61 }
  0x2b   :  { %405 = vmatpush.bf16.msrb.mxu0 %v702_v59 }
  0x2e   :  { %487 = vmatpush.bf16.msrb.mxu1 %v715_v62 }
  0x32   :  { %488 = vmatpush.bf16.msrb.mxu1 %v714_v63 }
  0x36   :  { %489 = vmatpush.bf16.msrb.mxu1 %v713_v8 }
  0x3a   :  { %490 = vmatpush.bf16.msrb.mxu1 %v712_v9 }
  0x3e   :  { %491 = vmatpush.bf16.msrb.mxu1 %v711_v10 }
  0x42   :  { %492 = vmatpush.bf16.msrb.mxu1 %v710_v11 }
  0x86   :  { %v70_v14 = vpop.f32.mrf.mxu0 }
  0x87   :  { %v71_v16 = vadd.f32 %v721_v15, %v70_v14 }
  0x89   :  { %v75_v19 = vmax.f32 %v71_v16, 0.0 }
  0x8e   :  { %v72_v17 = vpop.f32.mrf.mxu0 }
  0x8f   :  { %v73_v18 = vadd.f32 %v721_v15, %v72_v17 }
  0x91   :  { %v76_v20 = vmax.f32 %v73_v18, 0.0 }
  0x93   :  { %v77_v21 = vpack.c.bf16 %v76_v20, %v75_v19 }
  0x95   :  { %152 = vmatmul.bf16.vlgmr.msra.gmra.mxu1 %v77_v21 }
 0x112   :  { %v153_v30 = vpop.f32.mrf.mxu1 }
 0x113   :  { %v154_v32 = vadd.f32 %v722_v31, %v153_v30 }
 0x115   :  { %v158_v35 = vmax.f32 %v154_v32, 0.0 }
 0x11a   :  { %v155_v33 = vpop.f32.mrf.mxu1 }
 0x11b   :  { %v156_v34 = vadd.f32 %v722_v31, %v155_v33 }
 0x11d   :  { %v159_v36 = vmax.f32 %v156_v34, 0.0 }
 0x11f   :  { %v160_v37 = vpack.c.bf16 %v159_v36, %v158_v35 }
 0x121   :  { %236 = vmatmul.bf16.vlgmr.msra.gmra.mxu2 %v160_v37 }
 0x1a4   :  { %v237_v46 = vpop.f32.mrf.mxu2 }
 0x1a5   :  { %v238_v48 = vadd.f32 %v723_v47, %v237_v46 }
 0x1a7   :  { %v242_v50 = vadd.f32 %v238_v48, %v75_v19 }
 0x1a9   :  { %v244_v53 = vmax.f32 %v242_v50, 0.0 }
 0x1ac   :  { %v239_v49 = vpop.f32.mrf.mxu2 }
 0x1ad   :  { %v240_v51 = vadd.f32 %v723_v47, %v239_v49 }
 0x1af   :  { %v243_v52 = vadd.f32 %v240_v51, %v76_v20 }
 0x1b1   :  { %v245_v54 = vmax.f32 %v243_v52, 0.0 }
 0x1b3   :  { %v246_v55 = vpack.c.bf16 %v245_v54, %v244_v53 }
 0x1b5   :  { %322 = vmatmul.bf16.vlgmr.msra.gmra.mxu3 %v246_v55 }
 0x238   :  { %v323_v0 = vpop.f32.mrf.mxu3 }
 0x239   :  { %v324_v2 = vadd.f32 %v724_v1, %v323_v0 }
 0x23b   :  { %v328_v5 = vmax.f32 %v324_v2, 0.0 }
 0x240   :  { %v325_v3 = vpop.f32.mrf.mxu3 }
 0x241   :  { %v326_v4 = vadd.f32 %v724_v1, %v325_v3 }
 0x243   :  { %v329_v6 = vmax.f32 %v326_v4, 0.0 }
 0x245   :  { %v330_v7 = vpack.c.bf16 %v329_v6, %v328_v5 }
 0x247   :  { %406 = vmatmul.bf16.vlgmr.msrb.gmra.mxu0 %v330_v7 }
 0x2c4   :  { %v407_v12 = vpop.f32.mrf.mxu0 }
 0x2c5   :  { %v408_v14 = vadd.f32 %v725_v13, %v407_v12 }
 0x2c7   :  { %v412_v16 = vadd.f32 %v408_v14, %v244_v53 }
 0x2c9   :  { %v414_v19 = vmax.f32 %v412_v16, 0.0 }
 0x2cc   :  { %v409_v15 = vpop.f32.mrf.mxu0 }
 0x2cd   :  { %v410_v17 = vadd.f32 %v725_v13, %v409_v15 }
 0x2cf   :  { %v413_v18 = vadd.f32 %v410_v17, %v245_v54 }
 0x2d1   :  { %v415_v20 = vmax.f32 %v413_v18, 0.0 }
 0x2d3   :  { %v416_v21 = vpack.c.bf16 %v415_v20, %v414_v19 }
 0x2d5   :  { %493 = vmatmul.bf16.vlgmr.msrb.gmra.mxu1 %v416_v21 }
 0x352   :  { %v494_v23 = vpop.f32.mrf.mxu1 }
 0x353   :  { %v495_v24 = vadd.f32 %v726_v22, %v494_v23 }
 0x355   :  { %500 = vst.msk [vmem:[%s854_s6] sm:$0xff] %vm499_vm1, %v495_v24 }
 0x35a   :  { %v496_v25 = vpop.f32.mrf.mxu1 }
 0x35b   :  { %v497_v26 = vadd.f32 %v726_v22, %v496_v25 }
 0x35d   :  { %501 = vst.msk [vmem:[%s854_s6 + $0x8] sm:$0xff] %vm499_vm1, %v497_v26 }
 0x35e   :  { %506 = vsyncpa [#allocation3], 1 }

</bundles_post_ra>
